<compile_context>
chip_gen: v7x
topology: tpu7x:2x2x1
jax: 0.10.0
libtpu: 0.0.40
codegen_flags: <defaults>
</compile_context>

<pallas_src>
import math

import jax
import jax.numpy as jnp
from jax.experimental import pallas as pl
from jax.experimental.pallas import tpu as pltpu

_LANE = 128
_TARGET_BLOCK_BYTES = 2 << 20      # ~2 MiB of f32 activation per (C, hw_tile) block
_PRECISION = jax.lax.Precision.HIGHEST


def _round_up(x, m):
    return ((x + m - 1) // m) * m


def _ca_layer_kernel(x_ref, wvg_ref, wz_ref, o_ref):
    """CALayer forward for one (batch-tile, spatial-tile) grid step.

    x_ref   : (b_tile, C, HW_TILE)  input activations (flattened NCHW)
    wvg_ref : (2C, C)               stacked [v; g] 1x1-conv weights, (out, in)
    wz_ref  : (C, C)                z 1x1-conv weight, (out, in)
    o_ref   : (b_tile, C, HW_TILE)  output
    """
    wvg = wvg_ref[...].astype(jnp.float32)          # (2C, C)
    wz = wz_ref[...].astype(jnp.float32)            # (C, C)
    c = wz.shape[0]
    b_tile = x_ref.shape[0]

    for b in range(b_tile):                         # static unroll (b_tile is small)
        x = x_ref[b].astype(jnp.float32)            # (C, HW_TILE)

        # v(x) and g(x) in a single MXU pass: (2C, C) @ (C, HW_TILE).
        vg = jnp.dot(wvg, x,
                     preferred_element_type=jnp.float32,
                     precision=_PRECISION)          # (2C, HW_TILE)
        y1 = vg[:c, :]
        y2 = vg[c:, :]

        # softmax along the channel (sublane) axis.
        y1 = y1 - jnp.max(y1, axis=0, keepdims=True)      # XLU sublane reduce
        e = jnp.exp(y1)                                     # EUP
        y1 = e / jnp.sum(e, axis=0, keepdims=True)          # exact division

        # z(y1 * y2) on the MXU, then residual add (re-load x to keep its
        # live range short once the convs occupy the MXU).
        out = jnp.dot(wz, y1 * y2,
                      preferred_element_type=jnp.float32,
                      precision=_PRECISION)                 # (C, HW_TILE)
        o_ref[b] = (x_ref[b].astype(jnp.float32) + out).astype(o_ref.dtype)


def _pick_tiles(n, c, hw):
    """Pick (b_tile, hw_tile, num_hw_tiles) from a per-block byte budget."""
    hw_padded = _round_up(hw, _LANE)
    hw_tile = max(_LANE, (_TARGET_BLOCK_BYTES // (4 * c)) // _LANE * _LANE)
    hw_tile = min(hw_tile, hw_padded)
    num_hw_tiles = pl.cdiv(hw, hw_tile)

    b_tile = 1
    if num_hw_tiles == 1 and n > 1:
        # Whole image fits in one tile: pack batch elements per step to
        # amortize per-grid-step overhead, but keep >= 2 parallel grid steps
        # so the v7x megacore can shard across both TensorCores.
        per_image_bytes = 4 * c * hw_tile
        want = max(1, _TARGET_BLOCK_BYTES // per_image_bytes)
        max_b = max(1, n // 2)
        b_tile = min(want, max_b)
        while n % b_tile != 0:          # keep the batch axis exactly tiled
            b_tile -= 1
    return b_tile, hw_tile, num_hw_tiles


def ca_layer_forward(x_nchw, wv, wg, wz):
    """x_nchw: (N, C, H, W) -> (N, C, H, W), matching the PyTorch CALayer."""
    N, C, H, W = x_nchw.shape
    HW = H * W
    itemsize = jnp.dtype(x_nchw.dtype).itemsize

    b_tile, hw_tile, num_hw_tiles = _pick_tiles(N, C, HW)
    num_b_tiles = N // b_tile

    # Flattened NCHW == channels-on-sublanes / spatial-on-lanes: no transpose.
    x_flat = x_nchw.reshape(N, C, HW)
    wvg = jnp.concatenate([wv, wg], axis=0)          # (2C, C): one MXU pass for v & g

    # Explicit VMEM budget: 2x2 double-buffered I/O blocks + ~10 f32-block
    # intermediates + weights.  Clamp to [32 MiB, 48 MiB] so v5e's 16 MiB
    # default scoped limit is lifted while staying safely inside v7x's 64 MiB.
    block_io = b_tile * C * hw_tile * itemsize
    block_f32 = b_tile * C * hw_tile * 4
    w_bytes = (2 * C * C + C * C) * 4
    est = 4 * block_io + 10 * block_f32 + 2 * w_bytes
    vmem_limit = int(min(48 << 20, max(32 << 20, est + (8 << 20))))

    out_flat = pl.pallas_call(
        _ca_layer_kernel,
        out_shape=jax.ShapeDtypeStruct((N, C, HW), x_nchw.dtype),
        grid_spec=pltpu.PrefetchScalarGridSpec(
            num_scalar_prefetch=0,
            grid=(num_b_tiles, num_hw_tiles),
            in_specs=[
                pl.BlockSpec((b_tile, C, hw_tile), lambda n, s: (n, 0, s)),
                pl.BlockSpec((2 * C, C), lambda n, s: (0, 0)),
                pl.BlockSpec((C, C), lambda n, s: (0, 0)),
            ],
            out_specs=pl.BlockSpec((b_tile, C, hw_tile), lambda n, s: (n, 0, s)),
        ),
        compiler_params=pltpu.CompilerParams(
            dimension_semantics=("parallel", "parallel"),
            vmem_limit_bytes=vmem_limit),
    )(x_flat, wvg, wz)

    return out_flat.reshape(N, C, H, W)


def ca_layer_reference(x, wv, wg, wz):
    """Pure-JAX reference mirroring the PyTorch module (f32, highest precision)."""
    p = jax.lax.Precision.HIGHEST
    y1 = jnp.einsum("oi,nihw->nohw", wv, x, precision=p)
    y1 = jax.nn.softmax(y1, axis=1)
    y2 = jnp.einsum("oi,nihw->nohw", wg, x, precision=p)
    out = jnp.einsum("oi,nihw->nohw", wz, y1 * y2, precision=p)
    return x + out


if __name__ == "__main__":
    N, C, H, W = 2, 8, 16, 16

    key = jax.random.PRNGKey(0)
    kx, kv, kg, kz = jax.random.split(key, 4)

    x = jax.random.normal(kx, (N, C, H, W), dtype=jnp.float32)

    # PyTorch Conv2d default init (kaiming_uniform, a=sqrt(5), 1x1 kernel, no bias):
    # U(-1/sqrt(fan_in), 1/sqrt(fan_in)); torch weight (C, C, 1, 1) -> squeezed (out, in).
    bound = 1.0 / math.sqrt(C)
    wv = jax.random.uniform(kv, (C, C), jnp.float32, -bound, bound)
    wg = jax.random.uniform(kg, (C, C), jnp.float32, -bound, bound)
    wz = jax.random.uniform(kz, (C, C), jnp.float32, -bound, bound)

    out = jax.block_until_ready(ca_layer_forward(x, wv, wg, wz))
    ref = jax.block_until_ready(ca_layer_reference(x, wv, wg, wz))

    assert out.shape == (N, C, H, W), out.shape
    max_err = float(jnp.max(jnp.abs(out - ref)))
    assert jnp.allclose(out, ref, rtol=1e-5, atol=1e-5), max_err
    print("KERNEL_OK")
</pallas_src>

<mosaic_0001>
module attributes {stable_mosaic.version = 11 : i64} {
  func.func @_ca_layer_kernel(%arg0: i32, %arg1: i32, %arg2: memref<1x8x256xf32, #tpu.memory_space<vmem>>, %arg3: memref<16x8xf32, #tpu.memory_space<vmem>>, %arg4: memref<8x8xf32, #tpu.memory_space<vmem>>, %arg5: memref<1x8x256xf32, #tpu.memory_space<vmem>>) attributes {dimension_semantics = [#tpu.dimension_semantics<parallel>, #tpu.dimension_semantics<parallel>], iteration_bounds = array<i64: 2, 1>, scalar_prefetch = 0 : i64, scratch_operands = 0 : i64, tpu.core_type = #tpu.core_type<tc>, window_params = [{transform_indices = @transform_0, window_bounds = array<i64: 1, 8, 256>}, {pipeline_mode = #tpu.pipeline_mode<synchronous>, transform_indices = @transform_1, window_bounds = array<i64: 16, 8>}, {pipeline_mode = #tpu.pipeline_mode<synchronous>, transform_indices = @transform_2, window_bounds = array<i64: 8, 8>}, {transform_indices = @transform_3, window_bounds = array<i64: 1, 8, 256>}]} {
    %c0 = arith.constant 0 : index
    %c0_0 = arith.constant 0 : index
    %0 = vector.load %arg3[%c0, %c0_0] : memref<16x8xf32, #tpu.memory_space<vmem>>, vector<16x8xf32>
    %c0_1 = arith.constant 0 : index
    %c0_2 = arith.constant 0 : index
    %1 = vector.load %arg4[%c0_1, %c0_2] : memref<8x8xf32, #tpu.memory_space<vmem>>, vector<8x8xf32>
    %c0_3 = arith.constant 0 : index
    %c0_4 = arith.constant 0 : index
    %c0_5 = arith.constant 0 : index
    %2 = vector.load %arg2[%c0_3, %c0_4, %c0_5] : memref<1x8x256xf32, #tpu.memory_space<vmem>>, vector<1x8x256xf32>
    %3 = vector.shape_cast %2 : vector<1x8x256xf32> to vector<8x256xf32>
    %cst = arith.constant dense<0.000000e+00> : vector<16x256xf32>
    %4 = tpu.matmul %0, %3, %cst {dimension_numbers = #tpu.dot_dimension_numbers<[1], [0], [0], [1], [0, 0, 1, 1], [], []>, precision = #tpu.contract_precision<fp32>} : vector<16x8xf32>, vector<8x256xf32>, vector<16x256xf32> -> vector<16x256xf32>
    %5 = vector.extract_strided_slice %4 {offsets = [0, 0], sizes = [8, 256], strides = [1, 1]} : vector<16x256xf32> to vector<8x256xf32>
    %6 = vector.extract_strided_slice %4 {offsets = [8, 0], sizes = [8, 256], strides = [1, 1]} : vector<16x256xf32> to vector<8x256xf32>
    %cst_6 = arith.constant dense<0xFF800000> : vector<256xf32>
    %7 = vector.multi_reduction <maximumf>, %5, %cst_6 [0] : vector<8x256xf32> to vector<256xf32>
    %8 = vector.shape_cast %7 : vector<256xf32> to vector<1x256xf32>
    %9 = vector.broadcast %8 : vector<1x256xf32> to vector<8x256xf32>
    %10 = arith.subf %5, %9 : vector<8x256xf32>
    %11 = math.exp %10 : vector<8x256xf32>
    %cst_7 = arith.constant dense<0.000000e+00> : vector<256xf32>
    %12 = vector.multi_reduction <add>, %11, %cst_7 [0] : vector<8x256xf32> to vector<256xf32>
    %13 = vector.shape_cast %12 : vector<256xf32> to vector<1x256xf32>
    %14 = vector.broadcast %13 : vector<1x256xf32> to vector<8x256xf32>
    %15 = arith.divf %11, %14 : vector<8x256xf32>
    %16 = arith.mulf %15, %6 : vector<8x256xf32>
    %cst_8 = arith.constant dense<0.000000e+00> : vector<8x256xf32>
    %17 = tpu.matmul %1, %16, %cst_8 {dimension_numbers = #tpu.dot_dimension_numbers<[1], [0], [0], [1], [0, 0, 1, 1], [], []>, precision = #tpu.contract_precision<fp32>} : vector<8x8xf32>, vector<8x256xf32>, vector<8x256xf32> -> vector<8x256xf32>
    %c0_9 = arith.constant 0 : index
    %c0_10 = arith.constant 0 : index
    %c0_11 = arith.constant 0 : index
    %18 = vector.load %arg2[%c0_9, %c0_10, %c0_11] : memref<1x8x256xf32, #tpu.memory_space<vmem>>, vector<1x8x256xf32>
    %19 = vector.shape_cast %18 : vector<1x8x256xf32> to vector<8x256xf32>
    %20 = arith.addf %19, %17 : vector<8x256xf32>
    %c0_12 = arith.constant 0 : index
    %c0_13 = arith.constant 0 : index
    %c0_14 = arith.constant 0 : index
    %21 = vector.load %arg5[%c0_12, %c0_13, %c0_14] : memref<1x8x256xf32, #tpu.memory_space<vmem>>, vector<1x8x256xf32>
    %22 = vector.shape_cast %21 : vector<1x8x256xf32> to vector<8x256xf32>
    %23 = vector.shape_cast %20 : vector<8x256xf32> to vector<1x8x256xf32>
    tpu.vector_store %arg5[%c0_12, %c0_13, %c0_14], %23 {strides = array<i32>} : memref<1x8x256xf32, #tpu.memory_space<vmem>>, vector<1x8x256xf32>,
    return
  }
  func.func @transform_0(%arg0: i32, %arg1: i32) -> (i32, i32, i32) {
    %c0_i32 = arith.constant 0 : i32
    %c0_i32_0 = arith.constant 0 : i32
    return %arg0, %c0_i32, %arg1 : i32, i32, i32
  }
  func.func @transform_1(%arg0: i32, %arg1: i32) -> (i32, i32) {
    %c0_i32 = arith.constant 0 : i32
    %c0_i32_0 = arith.constant 0 : i32
    %c0_i32_1 = arith.constant 0 : i32
    return %c0_i32, %c0_i32_0 : i32, i32
  }
  func.func @transform_2(%arg0: i32, %arg1: i32) -> (i32, i32) {
    %c0_i32 = arith.constant 0 : i32
    %c0_i32_0 = arith.constant 0 : i32
    %c0_i32_1 = arith.constant 0 : i32
    return %c0_i32, %c0_i32_0 : i32, i32
  }
  func.func @transform_3(%arg0: i32, %arg1: i32) -> (i32, i32, i32) {
    %c0_i32 = arith.constant 0 : i32
    %c0_i32_0 = arith.constant 0 : i32
    return %arg0, %c0_i32, %arg1 : i32, i32, i32
  }
}

</mosaic_0001>

<bundles_post_ra>
// kernel: tpu_custom_call.1
= control target key start
LH: loop header
LB: loop body
LE: loop exit
PB: predicated region body
PF: predicated region fallthrough
CT: control target
= control target key end

     0   :  { %8 = vsyncpa [#allocation3], 0  ;;  %s1815_s0 = inlined_call_operand.hbm [shape: f32[2,8,256], index: 0, kind: input, shape index: {}]   ;;  %s1816_s1 = inlined_call_operand.vmem [shape: f32[16,8], index: 1, kind: input, shape index: {}]   ;;  %s1817_s2 = inlined_call_operand.vmem [shape: f32[8,8], index: 2, kind: input, shape index: {}]   ;;  %s1818_s3 = inlined_call_operand.hbm [shape: f32[2,8,256], index: 3, kind: output, shape index: {}]  }
   0x1   :  { %10 = vsyncpa [#allocation3 + $0x1], 0 }
   0x2   :  { %11 = vsyncpa [#allocation4], 0 }
   0x3   :  { %13 = vsyncpa [#allocation4 + $0x1], 0  ;;  %s1599_s12 = smov 0   ;;  %s1601_s13 = smov 0  }
   0x4   :  { %s1603_s14 = smov 0   ;;  %s1605_s15 = smov 0  }
   0x5   :  { %s1607_s16 = smov 0   ;;  %s1609_s17 = smov 0  }
   0x6 LB: > { %s1342_s18 = sadd.s32 4294967295, %s1574_s17   ;;  %s1343_s19 = sadd.s32 4294967294, %s1574_s17   ;;  %s1574_s17 = sphi %s1609_s17, %s19_s17   ;;  %s1570_s16 = sphi %s1607_s16, %s1834_s16   ;;  %s1566_s15 = sphi %s1605_s15, %s1833_s15   ;;  %s1562_s14 = sphi %s1603_s14, %s1832_s14   ;;  %s1558_s13 = sphi %s1601_s13, %s1831_s13   ;;  %s1554_s12 = sphi %s1599_s12, %s1830_s12  }
   0x7   : > { %s31_s20 = sadd.s32 1, %s1570_s16  ;;  %s40_s21 = sadd.s32 1, %s1562_s14 }
   0x8   : > { %p33_p0 = scmp.ge.s32.totalorder %s31_s20, 2  ;;  %p47_p1 = scmp.ne.s32.totalorder %s1562_s14, %s1558_s13 }
   0x9   : > { %p48_p2 = scmp.eq.s32.totalorder %s1574_s17, 0  ;;  %p53_p3 = scmp.ne.s32.totalorder %s1558_s13, %s1554_s12 }
   0xa   : > { %s1836_s20 = smov (%p33_p0, %s31_s20), 0  ;;  %p54_p5 = scmp.eq.s32.totalorder %s1342_s18, 0 }
   0xb   : > { %p1640_p4 = por %p48_p2, %p47_p1  ;;  %s35_s23 = ssub.s32 %s1570_s16, %s1836_s20 }
   0xc   : > { %p121_p6 = scmp.eq.s32.totalorder %s1342_s18, 1  ;;  %p38_p7 = scmp.eq.s32.totalorder %s35_s23, 0 }
   0xd   : > { %p1646_p8 = por %p54_p5, %p53_p3  ;;  %p127_p10 = scmp.eq.s32.totalorder %s1343_s19, 1 }
   0xe   : > { %p1650_p9 = por %p121_p6, %p47_p1  ;;  %p1403_p13 = scmp.lt.s32.totalorder %s1574_s17, 2 }
   0xf   : > { %s1655_s26 = scalar_select %p38_p7, %s1562_s14, %s40_s21  }
  0x10   : > { %s1822_s25 = scalar_select %p1650_p9, 1, 0 }
  0x11   : > { %p1657_p11 = por %p127_p10, %p53_p3  ;;  %s153_s28 = sand.u32 1, %s1562_s14  }
  0x12   : > { %s1346_s29 = sshll.u32 %s153_s28, 4  ;;  %s1357_s30 = sshll.u32 %s1570_s16, 8 }
  0x13   : > { %s1823_s27 = scalar_select %p1657_p11, 1, 0 }
  0x14   : > { %s1668_s6 = scalar_lea.hbm %s1815_s0, %s1357_s30  ;;  %s157_s7 = scalar_lea.vmem [#allocation2], %s1346_s29 }
  0x15   : > { %s167_s8 = sshll.u32 %s157_s7, 4  ;;  %p1674_p0 = pnand %p1403_p13, %p1640_p4  ;;  %s1670_s8 = int_to_ptr.vmem [resolvable:$true] %s167_s8 }
  0x16   : > { %s154_s10 = scalar_lea.sflag [#allocation3], %s153_s28  ;;  %s1462_s11 = scalar_lea.hbm %s1668_s6, 256 }
  0x17   : > { %p1463_p3 = scmp.ne.s32.totalorder %s1668_s6, %s1462_s11  ;;  %p1464_p5 = pneg %p1674_p0 }
  0x18   : > { %s1467_s21 = scalar_lea.hbm %s1815_s0, 512  ;;  %p1468_p4 = scmp.lt.u32.totalorder %s1668_s6, %s1815_s0 }
  0x19   : > { %p1465_p6 = pnand %p1464_p5, %p1463_p3  ;;  %p1469_p10 = scmp.lt.u32.totalorder %s1467_s21, %s1462_s11 }
  0x1a   : > { %p1471_p12 = scmp.lt.u32.totalorder %s1462_s11, %s1668_s6 }
  0x1b   : > { %p1466_p7 = pneg %p1465_p6  ;;  %p1470_p13 = por %p1469_p10, %p1468_p4 }
  0x1d   : > { %p1472_p1 = por %p1471_p12, %p1470_p13 }
  0x1f   : > { %p1473_p2 = pnand %p1472_p1, %p1466_p7 }
  0x21   : > { %1476 = shalt.err (!%p1473_p2)
}
  0x22   : > { %s1477_s28 = scalar_lea.vmem %s1670_s8, 256  ;;  %s1576_s29 = smov [#allocation2]  }
  0x23   : > { %p1478_p3 = scmp.ne.s32.totalorder %s1670_s8, %s1477_s28  ;;  %s1482_s30 = sshll.u32 %s1576_s29, 4  ;;  %s1483_s30 = int_to_ptr.vmem [resolvable:$false] %s1482_s30 }
  0x24   : > { %s1484_s4 = scalar_lea.vmem %s1483_s30, 512  ;;  %p1485_p9 = scmp.lt.s32.totalorder %s1670_s8, %s1483_s30 }
  0x25   : > { %p1480_p6 = pnand %p1478_p3, %p1464_p5  ;;  %p1486_p4 = scmp.lt.s32.totalorder %s1484_s4, %s1477_s28 }
  0x27   : > { %p1481_p11 = pneg %p1480_p6  ;;  %p1487_p10 = por %p1486_p4, %p1485_p9 }
  0x29   : > { %p1488_p12 = pnand %p1487_p10, %p1481_p11 }
  0x2b   : > { %1491 = shalt.err (!%p1488_p12)
}
  0x2c   : > { %1398 = dma.hbm_to_vmem [thread:$0]  (!%p1674_p0), %s1668_s6, 256, %s1670_s8, %s154_s10  }
  0x2d   : > { %p1825_p1 = scmp.lt.s32.totalorder %s1574_s17, 3  ;;  %p1826_p2 = scmp.ge.s32.totalorder %s1574_s17, 1 }
  0x2f   : > { %p173_p5 = pnand %p1826_p2, %p1825_p1 }
  0x30   : > { %s1710_s5 = sand.u32 (!%p173_p5), 1, %s1558_s13  }
  0x31   : > { %176 = sbr.rel (%p173_p5) target bundleno = 644 (0x284), region = 32  ;;  %s1350_s7 = sshll.u32 (!%p173_p5), %s1710_s5, 4 }
  0x32   : > { %s179_s11 = scalar_lea.sflag (!%p173_p5), [#allocation3], %s1710_s5  ;;  %s182_s9 = scalar_lea.vmem (!%p173_p5), [#allocation2], %s1350_s7 }
  0x38   : > { %1545 = dma.done.wait (%p1646_p8), %s179_s11, 256  }
  0x39   : > { %1547 = vsyncadd (%p1646_p8), %s179_s11, 4294967040  ;;  %v1577_v0 = vmov 0.0   ;;  %vm212_vm0 = vcmask 64512   ;;  %v1722_v1 = vld [vmem:[%s182_s9 + $0x8] sm:$0xff]  ;;  %v1724_v2 = vld [vmem:[%s182_s9] sm:$0xff]  ;;  %s1358_s21 = sshll.u32 %s1566_s15, 8 }
  0x3a   : > { %382 = vmatprep.mubr.f32.mxu0 %v1577_v0  ;;  %285 = vmatprep.mubr.f32.mxu1 %v1577_v0  ;;  %v207_v3 = vld [vmem:[%s1816_s1] sm:$0xff]  ;;  %v219_v4 = vand.u32 4294901760, %v1722_v1  ;;  %v221_v5 = vand.u32 4294901760, %v1724_v2  ;;  %v208_v7 = vld [vmem:[%s1816_s1 + $0x8] sm:$0xff]  ;;  %s204_s22 = scalar_lea.vmem [#allocation5], %s1350_s7  ;;  %s1766_s30 = scalar_lea.hbm %s1818_s3, %s1358_s21 }
  0x3b   : > { %v214_v6 = vsel %vm212_vm0, %v207_v3, 0  ;;  %v217_v9 = vsel %vm212_vm0, %v208_v7, 0  ;;  %v209_v63 = vld [vmem:[%s1817_s2] sm:$0xff]  ;;  %s1258_s23 = sshll.u32 %s204_s22, 4  ;;  %s1242_s15 = scalar_lea.sflag [#allocation4], %s1710_s5  ;;  %s1768_s23 = int_to_ptr.vmem [resolvable:$true] %s1258_s23 }
  0x3c   : > { %v286_v8 = vand.u32 4294901760, %v214_v6  ;;  %v309_v10 = vsub.f32 %v1722_v1, %v219_v4  ;;  %v315_v11 = vsub.f32 %v1724_v2, %v221_v5  ;;  %v297_v12 = vand.u32 4294901760, %v217_v9  ;;  %220 = vmatprep.subr.mxu1 %v219_v4  ;;  %s1492_s4 = scalar_lea.vmem %s1768_s23, 256  ;;  %p1827_p9 = scmp.ne.s32.totalorder %s1822_s25, 0 }
  0x3d   : > { %222 = vmatpush1.msra.mxu1 %v221_v5  ;;  %p1493_p8 = scmp.ne.s32.totalorder %s1768_s23, %s1492_s4  ;;  %s1578_s7 = smov [#allocation5]  }
  0x3e   : > { %v287_v13 = vsub.f32 %v214_v6, %v286_v8  ;;  %v310_v14 = vand.u32 4294901760, %v309_v10  ;;  %v316_v15 = vand.u32 4294901760, %v315_v11  ;;  %v298_v16 = vsub.f32 %v217_v9, %v297_v12  ;;  %s1496_s11 = sshll.u32 %s1578_s7, 4  ;;  %s1497_s11 = int_to_ptr.vmem [resolvable:$false] %s1496_s11 }
  0x3f   : > { %v770_v6 = vsel %vm212_vm0, %v209_v63, 0  ;;  %p1494_p11 = pnand %p1493_p8, %p1827_p9  ;;  %s1498_s9 = scalar_lea.vmem %s1497_s11, 512 }
  0x40   : > { %v288_v17 = vand.u32 4294901760, %v287_v13  ;;  %v311_v18 = vsub.f32 %v309_v10, %v310_v14  ;;  %v317_v19 = vsub.f32 %v315_v11, %v316_v15  ;;  %v299_v20 = vand.u32 4294901760, %v298_v16  ;;  %p1499_p7 = scmp.lt.s32.totalorder %s1768_s23, %s1497_s11  ;;  %p1500_p13 = scmp.lt.s32.totalorder %s1498_s9, %s1492_s4 }
  0x41   : > { %p1495_p0 = pneg %p1494_p11 }
  0x42   : > { %v289_v21 = vsub.f32 %v287_v13, %v288_v17  ;;  %v312_v22 = vand.u32 4294901760, %v311_v18  ;;  %v318_v23 = vand.u32 4294901760, %v317_v19  ;;  %v300_v24 = vsub.f32 %v298_v16, %v299_v20  ;;  %p1501_p3 = por %p1500_p13, %p1499_p7 }
  0x44   : > { %v290_v25 = vand.u32 4294901760, %v289_v21  ;;  %313 = vmatprep.subr.mxu0 %v312_v22  ;;  %1359 = vmatprep.subr.mxu1 %v312_v22  ;;  %v301_v26 = vand.u32 4294901760, %v300_v24  ;;  %p1502_p6 = pnand %p1501_p3, %p1495_p0 }
  0x45   : > { %319 = vmatpush1.msra.mxu0 %v318_v23 }
  0x46   : > { %291 = vmatmul.mubr.f32.vlgmr.msra.gmra.mrb[0].mxu1 %v290_v25  ;;  %384 = vmatmul.mubr.f32.vlgmr.msra.gmra.mrb[0].mxu0 %v286_v8 }
  0x47   : > { %399 = vmatprep.subr.mxu0 %v309_v10  ;;  %465 = vmatprep.mubr.f32.mxu0 %v1577_v0  ;;  %v839_v10 = vand.u32 4294901760, %v770_v6 }
  0x48   : > { %402 = vmatpush1.msra.mxu0 %v315_v11  ;;  %296 = vmatprep.mubr.f32.mxu1 %v1577_v0 }
  0x49   : > { %483 = vmatprep.subr.mxu0 %v219_v4  ;;  %1360 = vmatpush1.msra.mxu1 %v318_v23  ;;  %v840_v11 = vsub.f32 %v770_v6, %v839_v10 }
  0x4a   : > { %302 = vmatmul.mubr.f32.gmra.mrb[2].mxu1 %v301_v26 }
  0x4b   : > { %389 = vmatprep.mubr.f32.mxu1 %v1577_v0 }
  0x4e   : > { %468 = vmatmul.mubr.f32.vlgmr.msra.gmra.mrb[0].mxu0 %v287_v13 }
  0x4f   : > { %473 = vmatprep.mubr.f32.mxu0 %v1577_v0  ;;  %485 = vmatpush1.msra.mxu0 %v221_v5 }
  0x50   : > { %570 = vmatprep.subr.mxu0 %v310_v14 }
  0x52   : > { %391 = vmatmul.mubr.f32.vlgmr.msra.gmra.mrb[2].mxu1 %v297_v12  ;;  %476 = vmatmul.mubr.f32.gmra.mrb[2].mxu0 %v298_v16 }
  0x53   : > { %838 = vmatprep.mubr.f32.mxu1 %v1577_v0  ;;  %548 = vmatprep.mubr.f32.mxu0 %v1577_v0 }
  0x56   : > { %552 = vmatmul.mubr.f32.vlgmr.msra.gmra.mrb[0].mxu0 %v288_v17 }
  0x57   : > { %557 = vmatprep.mubr.f32.mxu0 %v1577_v0  ;;  %574 = vmatpush1.msra.mxu0 %v316_v15 }
  0x58   : > { %653 = vmatprep.subr.mxu0 %v219_v4 }
  0x5a   : > { %561 = vmatmul.mubr.f32.gmra.mrb[2].mxu0 %v299_v20 }
  0x5b   : > { %637 = vmatprep.mubr.f32.mxu0 %v1577_v0 }
  0x5e   : > { %639 = vmatmul.mubr.f32.vlgmr.msra.gmra.mrb[0].mxu0 %v286_v8 }
  0x5f   : > { %644 = vmatprep.mubr.f32.mxu0 %v1577_v0  ;;  %655 = vmatpush1.msra.mxu0 %v221_v5 }
  0x62   : > { %646 = vmatmul.mubr.f32.gmra.mrb[2].mxu0 %v297_v12 }
  0x63   : > { %718 = vmatprep.mubr.f32.mxu0 %v1577_v0 }
  0x66   : > { %720 = vmatmul.mubr.f32.vlgmr.msra.gmra.mrb[0].mxu0 %v286_v8 }
  0x67   : > { %725 = vmatprep.mubr.f32.mxu0 %v1577_v0 }
  0x6a   : > { %727 = vmatmul.mubr.f32.gmra.mrb[2].mxu0 %v297_v12  ;;  %v841_v12 = vand.u32 4294901760, %v840_v11 }
  0x6c   : > { %v842_v17 = vsub.f32 %v840_v11, %v841_v12 }
  0x6e   : > { %v843_v22 = vand.u32 4294901760, %v842_v17 }
 0x119   : > { %v292_v27 = vpop.f32.mrb[0].mxu1 }
 0x11a   : > { %v294_v28 = vpop.f32.mrb[1].mxu1 }
 0x125   : > { %v392_v29 = vpop.f32.mrb[2].mxu1 }
 0x126   : > { %v394_v30 = vpop.f32.mrb[3].mxu1 }
 0x139   : > { %v721_v31 = vpop.f32.mrb[0].mxu0 }
 0x13a   : > { %v1361_v32 = vadd.f32 %v721_v31, %v292_v27  ;;  %v723_v33 = vpop.f32.mrb[1].mxu0 }
 0x13b   : > { %v1362_v34 = vadd.f32 %v723_v33, %v294_v28 }
 0x13c   : > { %v733_v35 = vrot.slane %v1361_v32, 4 }
 0x13d   : > { %v739_v36 = vrot.slane %v1362_v34, 4  ;;  %v728_v37 = vpop.f32.mrb[2].mxu0 }
 0x13e   : > { %v734_v38 = vmax.f32 %v1361_v32, %v733_v35  ;;  %v1363_v39 = vadd.f32 %v728_v37, %v392_v29  ;;  %v730_v40 = vpop.f32.mrb[3].mxu0 }
 0x13f   : > { %v740_v41 = vmax.f32 %v1362_v34, %v739_v36  ;;  %v1364_v42 = vadd.f32 %v730_v40, %v394_v30 }
 0x140   : > { %v735_v43 = vrot.slane %v734_v38, 2 }
 0x141   : > { %v741_v44 = vrot.slane %v740_v41, 2 }
 0x142   : > { %v736_v45 = vmax.f32 %v734_v38, %v735_v43 }
 0x143   : > { %v742_v46 = vmax.f32 %v740_v41, %v741_v44 }
 0x144   : > { %v737_v47 = vrot.slane %v736_v45, 1 }
 0x145   : > { %v743_v48 = vrot.slane %v742_v46, 1 }
 0x146   : > { %v738_v49 = vmax.f32 %v736_v45, %v737_v47 }
 0x147   : > { %v744_v50 = vmax.f32 %v742_v46, %v743_v48 }
 0x148   : > { %v745_v51 = vsub.f32 %v1361_v32, %v738_v49 }
 0x149   : > { %v746_v52 = vsub.f32 %v1362_v34, %v744_v50 }
 0x14a   : > { %v747_v53 = vmul.f32 1.442695, %v745_v51 }
 0x14b   : > { %v749_v54 = vmul.f32 1.442695, %v746_v52 }
 0x14c   : > { %1454 = vpow2.f32 %v747_v53 }
 0x14d   : > { %1456 = vpow2.f32 %v749_v54 }
 0x156   : > { %v1455_v55 = vpop.eup %1454 }
 0x157   : > { %v1457_v56 = vpop.eup %1456  ;;  %v751_v57 = vrot.slane %v1455_v55, 4 }
 0x158   : > { %v757_v58 = vrot.slane %v1457_v56, 4 }
 0x159   : > { %v752_v59 = vadd.f32 %v1455_v55, %v751_v57 }
 0x15a   : > { %v758_v60 = vadd.f32 %v1457_v56, %v757_v58 }
 0x15b   : > { %v753_v61 = vrot.slane %v752_v59, 2 }
 0x15c   : > { %v759_v62 = vrot.slane %v758_v60, 2 }
 0x15d   : > { %v754_v3 = vadd.f32 %v753_v61, %v752_v59 }
 0x15e   : > { %v760_v4 = vadd.f32 %v759_v62, %v758_v60 }
 0x15f   : > { %v755_v5 = vrot.slane %v754_v3, 1 }
 0x160   : > { %v761_v7 = vrot.slane %v760_v4, 1 }
 0x161   : > { %v756_v8 = vadd.f32 %v755_v5, %v754_v3 }
 0x162   : > { %v762_v9 = vadd.f32 %v761_v7, %v760_v4 }
 0x163   : > { %1458 = vrcp.f32 %v756_v8 }
 0x164   : > { %1460 = vrcp.f32 %v762_v9 }
 0x16d   : > { %v1459_v13 = vpop.eup %1458 }
 0x16e   : > { %v1461_v14 = vpop.eup %1460  ;;  %v764_v15 = vmul.f32 %v1459_v13, %v1455_v55 }
 0x16f   : > { %v766_v16 = vmul.f32 %v1461_v14, %v1457_v56 }
 0x170   : > { %v767_v18 = vmul.f32 %v1363_v39, %v764_v15 }
 0x171   : > { %v768_v19 = vmul.f32 %v1364_v42, %v766_v16 }
 0x172   : > { %v774_v20 = vand.u32 4294901760, %v767_v18 }
 0x173   : > { %v772_v21 = vand.u32 4294901760, %v768_v19 }
 0x174   : > { %v857_v23 = vsub.f32 %v767_v18, %v774_v20 }
 0x175   : > { %v851_v24 = vsub.f32 %v768_v19, %v772_v21  ;;  %773 = vmatprep.subr.mxu1 %v772_v21 }
 0x176   : > { %v858_v25 = vand.u32 4294901760, %v857_v23  ;;  %775 = vmatpush1.msra.mxu1 %v774_v20 }
 0x177   : > { %844 = vmatmul.mubr.f32.vlgmr.msra.gmra.mrb[4].mxu1 %v843_v22  ;;  %v852_v26 = vand.u32 4294901760, %v851_v24 }
 0x178   : > { %v859_v27 = vsub.f32 %v857_v23, %v858_v25  ;;  %924 = vmatprep.mubr.f32.mxu1 %v1577_v0 }
 0x179   : > { %v853_v28 = vsub.f32 %v851_v24, %v852_v26 }
 0x17a   : > { %v860_v30 = vand.u32 4294901760, %v859_v27 }
 0x17b   : > { %v854_v29 = vand.u32 4294901760, %v853_v28 }
 0x17d   : > { %855 = vmatprep.subr.mxu1 %v854_v29 }
 0x17e   : > { %861 = vmatpush1.msra.mxu1 %v860_v30 }
 0x17f   : > { %926 = vmatmul.mubr.f32.vlgmr.msra.gmra.mrb[4].mxu1 %v839_v10  ;;  %934 = vmatprep.subr.mxu1 %v851_v24 }
 0x180   : > { %937 = vmatpush1.msra.mxu1 %v857_v23  ;;  %1000 = vmatprep.mubr.f32.mxu1 %v1577_v0 }
 0x181   : > { %1010 = vmatprep.subr.mxu1 %v772_v21 }
 0x187   : > { %1003 = vmatmul.mubr.f32.vlgmr.msra.gmra.mrb[4].mxu1 %v840_v11 }
 0x188   : > { %1012 = vmatpush1.msra.mxu1 %v774_v20  ;;  %1075 = vmatprep.mubr.f32.mxu1 %v1577_v0 }
 0x189   : > { %1088 = vmatprep.subr.mxu1 %v852_v26 }
 0x18f   : > { %1079 = vmatmul.mubr.f32.vlgmr.msra.gmra.mrb[4].mxu1 %v841_v12 }
 0x190   : > { %1092 = vmatpush1.msra.mxu1 %v858_v25  ;;  %1155 = vmatprep.mubr.f32.mxu1 %v1577_v0 }
 0x191   : > { %1164 = vmatprep.subr.mxu1 %v772_v21 }
 0x197   : > { %1157 = vmatmul.mubr.f32.vlgmr.msra.gmra.mrb[4].mxu1 %v839_v10 }
 0x198   : > { %1166 = vmatpush1.msra.mxu1 %v774_v20  ;;  %1229 = vmatprep.mubr.f32.mxu1 %v1577_v0 }
 0x19f   : > { %1231 = vmatmul.mubr.f32.vlgmr.msra.gmra.mrb[4].mxu1 %v839_v10 }
 0x272   : > { %v1232_v31 = vpop.f32.mrb[4].mxu1 }
 0x273   : > { %v1237_v32 = vadd.f32 %v1232_v31, %v1724_v2  ;;  %v1234_v33 = vpop.f32.mrb[5].mxu1 }
 0x274   : > { %v1238_v34 = vadd.f32 %v1234_v33, %v1722_v1 }
 0x275   : > { %1239 = vst [vmem:[%s204_s22] sm:$0xff] %v1237_v32 }
 0x276   : > { %1240 = vst [vmem:[%s204_s22 + $0x8] sm:$0xff] %v1238_v34 }
 0x277   : > { %1505 = shalt.err (!%p1502_p6)
}
 0x278   : > { %s1506_s5 = scalar_lea.hbm %s1766_s30, 256  ;;  %s1510_s24 = scalar_lea.hbm %s1818_s3, 512 }
 0x279   : > { %p1507_p4 = scmp.ne.s32.totalorder %s1766_s30, %s1506_s5  ;;  %p1511_p1 = scmp.lt.u32.totalorder %s1766_s30, %s1818_s3 }
 0x27a   : > { %p1512_p2 = scmp.lt.u32.totalorder %s1510_s24, %s1506_s5  ;;  %p1514_p8 = scmp.lt.u32.totalorder %s1506_s5, %s1766_s30 }
 0x27b   : > { %p1508_p10 = pnand %p1507_p4, %p1827_p9 }
 0x27c   : > { %p1513_p5 = por %p1512_p2, %p1511_p1 }
 0x27d   : > { %p1509_p12 = pneg %p1508_p10 }
 0x27e   : > { %p1515_p11 = por %p1514_p8, %p1513_p5 }
 0x280   : > { %p1516_p0 = pnand %p1515_p11, %p1509_p12 }
 0x282   : > { %1519 = shalt.err (!%p1516_p0)
}
 0x283   : > { %1393 = dma.vmem_to_hbm [thread:$0]  (%p1827_p9), %s1768_s23, 256, %s1766_s30, %s1242_s15  }
 0x284 PF: > { %s1270_s19 = sand.u32 1, %s1554_s12   ;;  %p1828_p7 = scmp.ne.s32.totalorder %s1823_s27, 0 }
 0x285   : > { %p1829_p13 = scmp.ge.s32.totalorder %s1574_s17, 2  ;;  %s1271_s21 = scalar_lea.sflag [#allocation4], %s1270_s19 }
 0x287   : > { %p1400_p3 = pnand %p1829_p13, %p1828_p7 }
 0x289   : > { %1549 = dma.done.wait (!%p1400_p3), %s1271_s21, 256  }
 0x28a   : > { %1551 = vsyncadd (!%p1400_p3), %s1271_s21, 4294967040  ;;  %s19_s17 = sadd.s32 1, %s1574_s17   ;;  %s1830_s12 = smov %s1558_s13 }
 0x28b   : > { %p16_p6 = scmp.ge.s32.totalorder %s19_s17, 4   ;;  %s1831_s13 = smov %s1562_s14 }
 0x28c   : > { %s1832_s14 = smov %s1655_s26  ;;  %s1833_s15 = smov %s1570_s16 }
 0x28d   : > { %s1834_s16 = smov %s1836_s20  ;;  %18 = sbr.rel (!%p16_p6) target bundleno = 6 (0x6), region = 77 }
 0x294   :  { %1276 = vsyncpa [#allocation3], 1 }
 0x295   :  { %1278 = vsyncpa [#allocation3 + $0x1], 1 }
 0x296   :  { %1279 = vsyncpa [#allocation4], 1 }
 0x297   :  { %1281 = vsyncpa [#allocation4 + $0x1], 1 }

</bundles_post_ra>
